<compile_context>
chip_gen: v5e
topology: v5e:2x2
jax: 0.10.0
libtpu: 0.0.40
codegen_flags: <defaults>
</compile_context>

<pallas_src>
import jax
import jax.numpy as jnp
from jax import lax
from jax.experimental import pallas as pl
from jax.experimental.pallas import tpu as pltpu

SMOOTH = 1e-8
LANE = 128
SUBLANE = 8
ROW8 = SUBLANE * LANE          # 1024 elements per (8, 128) row-group
SUB_R8 = 8                     # sub-chunk = 8 row-groups = 64 rows = 32 KiB f32


def _cdiv(a, b):
    return -(-a // b)


def _sigmoid(x):
    # One EUP push (tanh) instead of exp + reciprocal.
    return 0.5 * jnp.tanh(0.5 * x) + 0.5


def _make_kernel(*, b_tile, tr8, n_tiles, valid_elems, needs_mask):
    """Builds the kernel. Blocks: x/t (b_tile, tr8, 8, 128); outputs
    prod/den (b_tile, 8, 128) per-sample vector partials, resident across
    the spatial-tile grid axis."""
    tile_elems = tr8 * ROW8

    def kernel(x_ref, t_ref, prod_ref, den_ref):
        @pl.when(pl.program_id(1) == 0)
        def _():
            prod_ref[...] = jnp.zeros_like(prod_ref)
            den_ref[...] = jnp.zeros_like(den_ref)

        tile_base = pl.program_id(1) * tile_elems   # within-sample elem offset

        def run(masked):
            def chunk(off_r8, size_r8, carry):
                prod, den = carry
                x = x_ref[:, pl.ds(off_r8, size_r8), :, :].astype(jnp.float32)
                t = t_ref[:, pl.ds(off_r8, size_r8), :, :].astype(jnp.float32)
                s = _sigmoid(x)
                if masked:
                    shape = (size_r8, SUBLANE, LANE)
                    idx = (lax.broadcasted_iota(jnp.int32, shape, 0) * ROW8
                           + lax.broadcasted_iota(jnp.int32, shape, 1) * LANE
                           + lax.broadcasted_iota(jnp.int32, shape, 2))
                    idx = idx + tile_base + off_r8 * ROW8
                    valid = (idx < valid_elems)[None]   # broadcast over batch
                    s = jnp.where(valid, s, 0.0)
                    t = jnp.where(valid, t, 0.0)
                # Reduce only the row-group axis -> pure VPU vreg adds; the
                # cross-lane/sublane reduce happens once in the wrapper.
                prod = prod + jnp.sum(s * t, axis=1)
                den = den + jnp.sum(s + t, axis=1)
                return prod, den

            zeros = jnp.zeros((b_tile, SUBLANE, LANE), jnp.float32)
            carry = (zeros, zeros)
            sub = min(SUB_R8, tr8)
            n_full = tr8 // sub
            rem = tr8 - n_full * sub
            if n_full == 1:
                carry = chunk(0, sub, carry)
            else:
                carry = lax.fori_loop(
                    0, n_full,
                    lambda j, c: chunk(pl.multiple_of(j * sub, sub), sub, c),
                    carry)
            if rem:
                carry = chunk(n_full * sub, rem, carry)
            prod, den = carry
            prod_ref[...] += prod
            den_ref[...] += den

        if needs_mask:
            # Padding / partial-block garbage can only live in the last tile.
            is_last = pl.program_id(1) == n_tiles - 1

            @pl.when(jnp.logical_not(is_last))
            def _():
                run(False)

            @pl.when(is_last)
            def _():
                run(True)
        else:
            run(False)

    return kernel


def dice_loss(inputs, target, *, tile_rows=8192):
    """Pallas TPU implementation of DiceLoss.forward. inputs/target: (N,C,H,W)."""
    if inputs.shape != target.shape:
        raise ValueError("inputs and target must have the same shape")
    N = inputs.shape[0]
    P = 1
    for d in inputs.shape[1:]:
        P *= d

    x = inputs.reshape(N, P)
    t = target.reshape(N, P)

    # Lane-dense per-sample view: rows8 groups of (8, 128).  Pad only to the
    # next multiple of 1024 elements; the multiple-of-1024 case (typical
    # segmentation shapes) is a zero-copy bitcast reshape.
    rows8 = _cdiv(P, ROW8)
    pad = rows8 * ROW8 - P
    if pad:
        x = jnp.pad(x, ((0, 0), (0, pad)))
        t = jnp.pad(t, ((0, 0), (0, pad)))
    x = x.reshape(N, rows8, SUBLANE, LANE)
    t = t.reshape(N, rows8, SUBLANE, LANE)

    # --- tile selection -----------------------------------------------------
    tr8_cap = max(1, int(tile_rows) // 8)
    if tr8_cap >= SUB_R8:
        tr8_cap = (tr8_cap // SUB_R8) * SUB_R8   # keep sub-chunking clean

    if rows8 <= tr8_cap:
        # Whole sample fits in one tile -> batch-block samples per grid step.
        tr8 = rows8
        n_tiles = 1
        max_b = max(1, tr8_cap // rows8)
        b_tile = 1
        for d in range(min(N, max_b), 0, -1):
            if N % d == 0:
                b_tile = d
                break
    else:
        tr8 = tr8_cap
        n_tiles = _cdiv(rows8, tr8)
        b_tile = 1

    # Mask needed if the grid covers more elements per sample than are valid
    # (explicit 1024-pad and/or a partial last block along the rows8 axis).
    needs_mask = (n_tiles * tr8 * ROW8) != P

    kernel = _make_kernel(b_tile=b_tile, tr8=tr8, n_tiles=n_tiles,
                          valid_elems=P, needs_mask=needs_mask)

    # VMEM budget: 2 pipeline buffers per input tile + bounded sub-chunk
    # temporaries + tiny resident accumulators.
    tile_bytes = b_tile * tr8 * ROW8 * (x.dtype.itemsize + t.dtype.itemsize)
    vmem_limit = int(min(100 * 1024 * 1024,
                         max(16 * 1024 * 1024, 3 * tile_bytes + (4 << 20))))

    out_vec = jax.ShapeDtypeStruct((N, SUBLANE, LANE), jnp.float32)
    prod_p, den_p = pl.pallas_call(
        kernel,
        out_shape=(out_vec, out_vec),
        grid_spec=pltpu.PrefetchScalarGridSpec(
            num_scalar_prefetch=0,
            grid=(N // b_tile, n_tiles),
            in_specs=[
                pl.BlockSpec((b_tile, tr8, SUBLANE, LANE),
                             lambda b, i: (b, i, 0, 0)),
                pl.BlockSpec((b_tile, tr8, SUBLANE, LANE),
                             lambda b, i: (b, i, 0, 0)),
            ],
            out_specs=[
                pl.BlockSpec((b_tile, SUBLANE, LANE), lambda b, i: (b, 0, 0)),
                pl.BlockSpec((b_tile, SUBLANE, LANE), lambda b, i: (b, 0, 0)),
            ],
        ),
        compiler_params=pltpu.CompilerParams(
            # Batch axis shardable across TensorCores (v7x megacore); the
            # spatial-tile axis carries the resident accumulators.
            dimension_semantics=("parallel", "arbitrary"),
            vmem_limit_bytes=vmem_limit,
        ),
    )(x, t)

    # Cheap finalization in the wrapper: cross-lane/sublane reduce + formula.
    num = 2.0 * jnp.sum(prod_p, axis=(1, 2))
    den = jnp.sum(den_p, axis=(1, 2))
    res = 1.0 - (num + SMOOTH) / (den + SMOOTH)
    return jnp.mean(res)


def dice_loss_ref(inputs, target):
    s = jax.nn.sigmoid(inputs.astype(jnp.float32))
    t = target.astype(jnp.float32)
    num = 2.0 * jnp.sum(s * t, axis=(1, 2, 3))
    den = jnp.sum(s + t, axis=(1, 2, 3))
    res = 1.0 - (num + SMOOTH) / (den + SMOOTH)
    return jnp.mean(res)


if __name__ == "__main__":
    key = jax.random.PRNGKey(0)
    k1, k2, k3, k4, k5, k6 = jax.random.split(key, 6)

    # Primary small test, consistent with the module's (N, C, H, W) usage.
    x = jax.random.normal(k1, (2, 4, 16, 16), dtype=jnp.float32)
    tgt = jax.random.uniform(k2, (2, 4, 16, 16), dtype=jnp.float32)
    out = jax.block_until_ready(dice_loss(x, tgt))
    ref = jax.block_until_ready(dice_loss_ref(x, tgt))
    assert jnp.allclose(out, ref, atol=1e-5, rtol=1e-5), (out, ref)

    # Ragged (non-1024-multiple) path -> in-kernel tail masking.
    x2 = jax.random.normal(k3, (2, 3, 15, 17), dtype=jnp.float32)
    t2 = jax.random.uniform(k4, (2, 3, 15, 17), dtype=jnp.float32)
    out2 = jax.block_until_ready(dice_loss(x2, t2))
    ref2 = jax.block_until_ready(dice_loss_ref(x2, t2))
    assert jnp.allclose(out2, ref2, atol=1e-5, rtol=1e-5), (out2, ref2)

    # Medium shape exercising fori_loop sub-chunking + batch blocking.
    x3 = jax.random.normal(k5, (2, 4, 72, 64), dtype=jnp.float32)
    t3 = (jax.random.uniform(k6, (2, 4, 72, 64)) > 0.5).astype(jnp.float32)
    out3 = jax.block_until_ready(dice_loss(x3, t3))
    ref3 = jax.block_until_ready(dice_loss_ref(x3, t3))
    assert jnp.allclose(out3, ref3, atol=1e-5, rtol=1e-5), (out3, ref3)

    print("KERNEL_OK")
</pallas_src>

<mosaic_0001>
module attributes {stable_mosaic.version = 11 : i64} {
  func.func @kernel(%arg0: i32, %arg1: i32, %arg2: memref<2x1x8x128xf32, #tpu.memory_space<vmem>>, %arg3: memref<2x1x8x128xf32, #tpu.memory_space<vmem>>, %arg4: memref<2x8x128xf32, #tpu.memory_space<vmem>>, %arg5: memref<2x8x128xf32, #tpu.memory_space<vmem>>) attributes {dimension_semantics = [#tpu.dimension_semantics<parallel>, #tpu.dimension_semantics<arbitrary>], iteration_bounds = array<i64: 1, 1>, scalar_prefetch = 0 : i64, scratch_operands = 0 : i64, tpu.core_type = #tpu.core_type<tc>, window_params = [{transform_indices = @transform_0, window_bounds = array<i64: 2, 1, 8, 128>}, {transform_indices = @transform_1, window_bounds = array<i64: 2, 1, 8, 128>}, {transform_indices = @transform_2, window_bounds = array<i64: 2, 8, 128>}, {transform_indices = @transform_3, window_bounds = array<i64: 2, 8, 128>}]} {
    %c0_i32 = arith.constant 0 : i32
    %0 = arith.cmpi eq, %arg1, %c0_i32 : i32
    %1 = arith.extui %0 : i1 to i32
    %c0_i32_0 = arith.constant 0 : i32
    %2 = arith.cmpi ne, %1, %c0_i32_0 : i32
    scf.if %2 {
      %cst_25 = arith.constant 0.000000e+00 : f32
      %25 = vector.broadcast %cst_25 : f32 to vector<2x8x128xf32>
      %c0_26 = arith.constant 0 : index
      %c0_27 = arith.constant 0 : index
      %c0_28 = arith.constant 0 : index
      %26 = vector.load %arg4[%c0_26, %c0_27, %c0_28] : memref<2x8x128xf32, #tpu.memory_space<vmem>>, vector<2x8x128xf32>
      tpu.vector_store %arg4[%c0_26, %c0_27, %c0_28], %25 {strides = array<i32>} : memref<2x8x128xf32, #tpu.memory_space<vmem>>, vector<2x8x128xf32>,
      %cst_29 = arith.constant 0.000000e+00 : f32
      %27 = vector.broadcast %cst_29 : f32 to vector<2x8x128xf32>
      %c0_30 = arith.constant 0 : index
      %c0_31 = arith.constant 0 : index
      %c0_32 = arith.constant 0 : index
      %28 = vector.load %arg5[%c0_30, %c0_31, %c0_32] : memref<2x8x128xf32, #tpu.memory_space<vmem>>, vector<2x8x128xf32>
      tpu.vector_store %arg5[%c0_30, %c0_31, %c0_32], %27 {strides = array<i32>} : memref<2x8x128xf32, #tpu.memory_space<vmem>>, vector<2x8x128xf32>,
    } else {
    }
    %cst = arith.constant 0.000000e+00 : f32
    %3 = vector.broadcast %cst : f32 to vector<2x8x128xf32>
    %c0 = arith.constant 0 : index
    %c0_1 = arith.constant 0 : index
    %c0_2 = arith.constant 0 : index
    %c0_3 = arith.constant 0 : index
    %4 = vector.load %arg2[%c0, %c0_1, %c0_2, %c0_3] : memref<2x1x8x128xf32, #tpu.memory_space<vmem>>, vector<2x1x8x128xf32>
    %c0_4 = arith.constant 0 : index
    %c0_5 = arith.constant 0 : index
    %c0_6 = arith.constant 0 : index
    %c0_7 = arith.constant 0 : index
    %5 = vector.load %arg3[%c0_4, %c0_5, %c0_6, %c0_7] : memref<2x1x8x128xf32, #tpu.memory_space<vmem>>, vector<2x1x8x128xf32>
    %cst_8 = arith.constant 5.000000e-01 : f32
    %6 = vector.broadcast %cst_8 : f32 to vector<2x1x8x128xf32>
    %7 = arith.mulf %6, %4 : vector<2x1x8x128xf32>
    %8 = math.tanh %7 : vector<2x1x8x128xf32>
    %cst_9 = arith.constant 5.000000e-01 : f32
    %9 = vector.broadcast %cst_9 : f32 to vector<2x1x8x128xf32>
    %10 = arith.mulf %9, %8 : vector<2x1x8x128xf32>
    %cst_10 = arith.constant 5.000000e-01 : f32
    %11 = vector.broadcast %cst_10 : f32 to vector<2x1x8x128xf32>
    %12 = arith.addf %10, %11 : vector<2x1x8x128xf32>
    %13 = arith.mulf %12, %5 : vector<2x1x8x128xf32>
    %cst_11 = arith.constant dense<0.000000e+00> : vector<2x8x128xf32>
    %14 = vector.multi_reduction <add>, %13, %cst_11 [1] : vector<2x1x8x128xf32> to vector<2x8x128xf32>
    %15 = arith.addf %3, %14 : vector<2x8x128xf32>
    %16 = arith.addf %12, %5 : vector<2x1x8x128xf32>
    %cst_12 = arith.constant dense<0.000000e+00> : vector<2x8x128xf32>
    %17 = vector.multi_reduction <add>, %16, %cst_12 [1] : vector<2x1x8x128xf32> to vector<2x8x128xf32>
    %18 = arith.addf %3, %17 : vector<2x8x128xf32>
    %c0_13 = arith.constant 0 : index
    %c0_14 = arith.constant 0 : index
    %c0_15 = arith.constant 0 : index
    %19 = vector.load %arg4[%c0_13, %c0_14, %c0_15] : memref<2x8x128xf32, #tpu.memory_space<vmem>>, vector<2x8x128xf32>
    %20 = arith.addf %19, %15 : vector<2x8x128xf32>
    %c0_16 = arith.constant 0 : index
    %c0_17 = arith.constant 0 : index
    %c0_18 = arith.constant 0 : index
    %21 = vector.load %arg4[%c0_16, %c0_17, %c0_18] : memref<2x8x128xf32, #tpu.memory_space<vmem>>, vector<2x8x128xf32>
    tpu.vector_store %arg4[%c0_16, %c0_17, %c0_18], %20 {strides = array<i32>} : memref<2x8x128xf32, #tpu.memory_space<vmem>>, vector<2x8x128xf32>,
    %c0_19 = arith.constant 0 : index
    %c0_20 = arith.constant 0 : index
    %c0_21 = arith.constant 0 : index
    %22 = vector.load %arg5[%c0_19, %c0_20, %c0_21] : memref<2x8x128xf32, #tpu.memory_space<vmem>>, vector<2x8x128xf32>
    %23 = arith.addf %22, %18 : vector<2x8x128xf32>
    %c0_22 = arith.constant 0 : index
    %c0_23 = arith.constant 0 : index
    %c0_24 = arith.constant 0 : index
    %24 = vector.load %arg5[%c0_22, %c0_23, %c0_24] : memref<2x8x128xf32, #tpu.memory_space<vmem>>, vector<2x8x128xf32>
    tpu.vector_store %arg5[%c0_22, %c0_23, %c0_24], %23 {strides = array<i32>} : memref<2x8x128xf32, #tpu.memory_space<vmem>>, vector<2x8x128xf32>,
    return
  }
  func.func @transform_0(%arg0: i32, %arg1: i32) -> (i32, i32, i32, i32) {
    %c0_i32 = arith.constant 0 : i32
    %c0_i32_0 = arith.constant 0 : i32
    %c0_i32_1 = arith.constant 0 : i32
    return %arg0, %arg1, %c0_i32, %c0_i32_0 : i32, i32, i32, i32
  }
  func.func @transform_1(%arg0: i32, %arg1: i32) -> (i32, i32, i32, i32) {
    %c0_i32 = arith.constant 0 : i32
    %c0_i32_0 = arith.constant 0 : i32
    %c0_i32_1 = arith.constant 0 : i32
    return %arg0, %arg1, %c0_i32, %c0_i32_0 : i32, i32, i32, i32
  }
  func.func @transform_2(%arg0: i32, %arg1: i32) -> (i32, i32, i32) {
    %c0_i32 = arith.constant 0 : i32
    %c0_i32_0 = arith.constant 0 : i32
    %c0_i32_1 = arith.constant 0 : i32
    return %arg0, %c0_i32, %c0_i32_0 : i32, i32, i32
  }
  func.func @transform_3(%arg0: i32, %arg1: i32) -> (i32, i32, i32) {
    %c0_i32 = arith.constant 0 : i32
    %c0_i32_0 = arith.constant 0 : i32
    %c0_i32_1 = arith.constant 0 : i32
    return %arg0, %c0_i32, %c0_i32_0 : i32, i32, i32
  }
}

</mosaic_0001>

<bundles_post_ra>
// kernel: tpu_custom_call.1
= control target key start
LH: loop header
LB: loop body
LE: loop exit
PB: predicated region body
PF: predicated region fallthrough
CT: control target
= control target key end

     0   :  { %9 = vsyncpa [#allocation3], 0  ;;  %s294_s0 = inlined_call_operand.hbm [shape: f32[2,1,8,128], index: 0, kind: input, shape index: {}]   ;;  %s295_s1 = inlined_call_operand.hbm [shape: f32[2,1,8,128], index: 1, kind: input, shape index: {}]   ;;  %s296_s2 = inlined_call_operand.hbm [shape: f32[2,8,128], index: 2, kind: output, shape index: {0}]   ;;  %s297_s3 = inlined_call_operand.hbm [shape: f32[2,8,128], index: 3, kind: output, shape index: {1}]  }
   0x1   :  { %10 = vsyncpa [#allocation6], 0 }
   0x2   :  { %11 = vsyncpa [#allocation4], 0 }
   0x3   :  { %12 = vsyncpa [#allocation9], 0  ;;  %s17_s14 = sshll.u32 %s294_s0, 4  ;;  %s244_s15 = smov [#allocation2]   ;;  %s18_s14 = int_to_ptr.hbm [resolvable:$true] %s17_s14 }
   0x4   :  { %s19_s16 = sshll.u32 %s244_s15, 4  ;;  %s30_s19 = sshll.u32 %s295_s1, 4  ;;  %s20_s16 = int_to_ptr.vmem [resolvable:$true] %s19_s16  ;;  %s31_s19 = int_to_ptr.hbm [resolvable:$true] %s30_s19 }
   0x5   :  { %s245_s20 = smov 128   ;;  %s246_s21 = smov 8  }
   0x6   :  { %25 = dma.hbm_to_vmem [thread:$0]  %s18_s14, 256, %s20_s16, [#allocation3], %s245_s20, %s245_s20, %s246_s21  }
   0x7   :  { %s247_s22 = smov [#allocation5]  }
   0x8   :  { %s32_s23 = sshll.u32 %s247_s22, 4  ;;  %s33_s23 = int_to_ptr.vmem [resolvable:$true] %s32_s23 }
   0x9   :  { %38 = dma.hbm_to_vmem [thread:$0]  %s31_s19, 256, %s33_s23, [#allocation6], %s245_s20, %s245_s20, %s246_s21  }
   0xa   :  { %236 = dma.done.wait [#allocation3], 256  }
   0xb   :  { %237 = vsyncadd [#allocation3], 4294967040 }
   0xc   :  { %238 = dma.done.wait [#allocation6], 256  }
   0xd   :  { %239 = vsyncadd [#allocation6], 4294967040  ;;  %v55_v0 = vld [vmem:[#allocation2] sm:$0xff]  ;;  %v56_v1 = vld [vmem:[#allocation2 + $0x8] sm:$0xff]  ;;  %s248_s0 = smov [#allocation7]   ;;  %s97_s26 = sshll.u32 %s296_s2, 4  ;;  %s98_s26 = int_to_ptr.hbm [resolvable:$true] %s97_s26 }
   0xe   :  { %v59_v2 = vmul.f32 0.5, %v55_v0  ;;  %v60_v3 = vmul.f32 0.5, %v56_v1  ;;  %v57_v7 = vld [vmem:[#allocation5] sm:$0xff]  ;;  %v58_v10 = vld [vmem:[#allocation5 + $0x8] sm:$0xff]  ;;  %s95_s1 = sshll.u32 %s248_s0, 4  ;;  %s249_s27 = smov [#allocation8]   ;;  %s96_s1 = int_to_ptr.vmem [resolvable:$true] %s95_s1 }
   0xf   :  { %s108_s28 = sshll.u32 %s249_s27, 4  ;;  %s110_s4 = sshll.u32 %s297_s3, 4  ;;  %s109_s28 = int_to_ptr.vmem [resolvable:$true] %s108_s28  ;;  %s111_s4 = int_to_ptr.hbm [resolvable:$true] %s110_s4 }
  0x10   :  { %136 = vtanh.f32 %v59_v2 }
  0x11   :  { %138 = vtanh.f32 %v60_v3 }
  0x16   :  { %v137_v4 = vpop.eup %136 }
  0x17   :  { %v139_v5 = vpop.eup %138  ;;  %v63_v6 = vmul.f32 0.5, %v137_v4 }
  0x18   :  { %v64_v8 = vmul.f32 0.5, %v139_v5 }
  0x19   :  { %v65_v9 = vadd.f32 0.5, %v63_v6 }
  0x1a   :  { %v66_v11 = vadd.f32 0.5, %v64_v8 }
  0x1b   :  { %v67_v12 = vmul.f32 %v65_v9, %v57_v7  ;;  %v73_v13 = vadd.f32 %v65_v9, %v57_v7 }
  0x1c   :  { %v68_v14 = vmul.f32 %v66_v11, %v58_v10  ;;  %v74_v15 = vadd.f32 %v66_v11, %v58_v10 }
  0x1d   :  { %83 = vst [vmem:[#allocation7] sm:$0xff] %v67_v12 }
  0x1e   :  { %84 = vst [vmem:[#allocation7 + $0x8] sm:$0xff] %v68_v14 }
  0x1f   :  { %89 = vst [vmem:[#allocation8] sm:$0xff] %v73_v13  ;;  %103 = dma.vmem_to_hbm [thread:$0]  %s96_s1, 256, %s98_s26, [#allocation4], %s245_s20, %s245_s20, %s246_s21  }
  0x20   :  { %90 = vst [vmem:[#allocation8 + $0x8] sm:$0xff] %v74_v15 }
  0x21   :  { %116 = dma.vmem_to_hbm [thread:$0]  %s109_s28, 256, %s111_s4, [#allocation9], %s245_s20, %s245_s20, %s246_s21  }
  0x22   :  { %240 = dma.done.wait [#allocation4], 256  }
  0x23   :  { %241 = vsyncadd [#allocation4], 4294967040 }
  0x24   :  { %242 = dma.done.wait [#allocation9], 256  }
  0x25   :  { %243 = vsyncadd [#allocation9], 4294967040 }
  0x26   :  { %125 = vsyncpa [#allocation3], 1 }
  0x27   :  { %126 = vsyncpa [#allocation6], 1 }
  0x28   :  { %127 = vsyncpa [#allocation4], 1 }
  0x29   :  { %128 = vsyncpa [#allocation9], 1 }

</bundles_post_ra>
